<compile_context>
chip_gen: v7x
topology: tpu7x:2x2x1
jax: 0.10.0
libtpu: 0.0.40
codegen_flags: <defaults>
</compile_context>

<pallas_src>
import jax
import jax.numpy as jnp
from jax.experimental import pallas as pl
from jax.experimental.pallas import tpu as pltpu

NUM_GROUPS = 2     # both GroupNorm layers in OBAtten use 2 groups
GN_EPS = 1e-5      # PyTorch GroupNorm default


def _group_norm(h, gamma, beta, *, num_groups=NUM_GROUPS, eps=GN_EPS):
    """GroupNorm over a (C, HW) tile; gamma/beta are (C, 1).

    Groups are statically unrolled (2 groups); each per-group slice starts at a
    multiple-of-8 sublane offset, so the slices/concat are tile-aligned and cheap.
    """
    C = h.shape[0]
    gs = C // num_groups
    parts = []
    for g in range(num_groups):
        hg = h[g * gs:(g + 1) * gs, :]
        # staged reductions: lanes first (XLU), then sublanes
        mu = jnp.mean(jnp.mean(hg, axis=1, keepdims=True), axis=0, keepdims=True)
        d = hg - mu
        var = jnp.mean(jnp.mean(d * d, axis=1, keepdims=True), axis=0, keepdims=True)
        parts.append(d * jax.lax.rsqrt(var + eps))
    hn = jnp.concatenate(parts, axis=0)
    return hn * gamma + beta


def _obatten_kernel(x_ref, w1_ref, g1_ref, b1_ref, w2_ref, g2_ref, b2_ref,
                    wat_ref, wb_ref, o_ref):
    x = x_ref[...]                                                      # (C_in, HW)

    # conv1: grouped 1x1 conv as block-diagonal dense matmul, then GroupNorm(2, C_mid)
    h1 = jnp.dot(w1_ref[...], x, preferred_element_type=jnp.float32)    # (C_mid, HW)
    h1 = _group_norm(h1, g1_ref[...], b1_ref[...])

    # conv2: grouped 1x1 conv, then GroupNorm(2, C_out)
    feat = jnp.dot(w2_ref[...], h1, preferred_element_type=jnp.float32)  # (C_out, HW)
    feat = _group_norm(feat, g2_ref[...], b2_ref[...])

    # SEM squeeze-excite: global avg pool -> 1x1 conv -> ReLU -> 1x1 conv -> sigmoid gate
    ch_mean = jnp.mean(feat, axis=1, keepdims=True)                     # (C_out, 1)
    z = jnp.sum(wat_ref[...] * ch_mean, axis=0, keepdims=True)          # (1, C_red)
    z = jnp.maximum(z, 0.0)                                             # ReLU
    s = jnp.sum(wb_ref[...] * z, axis=1, keepdims=True)                 # (C_out, 1)
    s = 1.0 / (1.0 + jnp.exp(-s))                                       # sigmoid (EUP)

    # out = relu(x + feat + feat * s) = relu(x + feat * (1 + s))
    o_ref[...] = jnp.maximum(x + feat * (1.0 + s), 0.0)


def obatten_forward(x, w1d, gamma1, beta1, w2d, gamma2, beta2, wa, wb):
    """x: (N, C_in, H, W) f32; w1d/w2d are dense block-diagonal 1x1-conv weights."""
    N, C_in, H, W = x.shape
    HW = H * W
    C_mid = w1d.shape[0]
    C_out = w2d.shape[0]
    C_red = wa.shape[0]

    x3 = x.reshape(N, C_in, HW)
    g1 = gamma1.reshape(C_mid, 1)
    b1 = beta1.reshape(C_mid, 1)
    g2 = gamma2.reshape(C_out, 1)
    b2 = beta2.reshape(C_out, 1)
    wat = wa.T                      # (C_out, C_red): avoids any in-kernel transpose

    const = lambda n: (0, 0)

    out3 = pl.pallas_call(
        _obatten_kernel,
        out_shape=jax.ShapeDtypeStruct((N, C_out, HW), x.dtype),
        grid_spec=pltpu.PrefetchScalarGridSpec(
            num_scalar_prefetch=0,
            grid=(N,),
            in_specs=[
                pl.BlockSpec((None, C_in, HW), lambda n: (n, 0, 0)),
                pl.BlockSpec((C_mid, C_in), const),
                pl.BlockSpec((C_mid, 1), const),
                pl.BlockSpec((C_mid, 1), const),
                pl.BlockSpec((C_out, C_mid), const),
                pl.BlockSpec((C_out, 1), const),
                pl.BlockSpec((C_out, 1), const),
                pl.BlockSpec((C_out, C_red), const),
                pl.BlockSpec((C_out, C_red), const),
            ],
            out_specs=pl.BlockSpec((None, C_out, HW), lambda n: (n, 0, 0)),
        ),
        compiler_params=pltpu.CompilerParams(
            dimension_semantics=("parallel",)),
    )(x3, w1d, g1, b1, w2d, g2, b2, wat, wb)
    return out3.reshape(N, C_out, H, W)


# ----------------------- pure-JAX reference (for correctness) -----------------------

def _gn_ref(h, groups, gamma, beta, eps=GN_EPS):
    N, C, H, W = h.shape
    hg = h.reshape(N, groups, C // groups, H, W)
    mu = hg.mean(axis=(2, 3, 4), keepdims=True)
    var = ((hg - mu) ** 2).mean(axis=(2, 3, 4), keepdims=True)
    hn = ((hg - mu) / jnp.sqrt(var + eps)).reshape(N, C, H, W)
    return hn * gamma.reshape(1, C, 1, 1) + beta.reshape(1, C, 1, 1)


def _ref_forward(x, w1d, g1, b1, w2d, g2, b2, wa, wb):
    h1 = jnp.einsum('oc,nchw->nohw', w1d, x, precision='highest')
    h1 = _gn_ref(h1, NUM_GROUPS, g1, b1)
    feat = jnp.einsum('oc,nchw->nohw', w2d, h1, precision='highest')
    feat = _gn_ref(feat, NUM_GROUPS, g2, b2)
    y = feat.mean(axis=(2, 3), keepdims=True)
    z = jax.nn.relu(jnp.einsum('rc,nchw->nrhw', wa, y, precision='highest'))
    s = jax.nn.sigmoid(jnp.einsum('cr,nrhw->nchw', wb, z, precision='highest'))
    feat1 = feat * s
    return jax.nn.relu(x + feat + feat1)


if __name__ == "__main__":
    key = jax.random.PRNGKey(0)
    keys = jax.random.split(key, 9)

    # OBAtten(ch_in=32, ch_out=32, kernel=3, reduction=16); input N=2, 16x16 spatial.
    # (ch_in must equal ch_out for the residual "x + feat" in the PyTorch forward.)
    N, H, W = 2, 16, 16
    ch_in = ch_out = 32
    reduction = 16
    C_mid = ch_out // 2                 # 16
    C_red = ch_out // reduction         # 2
    groups1 = (ch_out // 2) // 2        # 8  -> conv1: 32 -> 16 (4 in / 2 out per group)
    groups2 = ch_out // 2               # 16 -> conv2: 16 -> 32 (1 in / 2 out per group)

    x = jax.random.normal(keys[0], (N, ch_in, H, W), jnp.float32)

    # Grouped 1x1-conv weights (PyTorch layout (C_out, C_in/groups)) -> dense block-diagonal.
    w1_raw = jax.random.normal(keys[1], (C_mid, ch_in // groups1), jnp.float32) * 0.3
    w2_raw = jax.random.normal(keys[2], (ch_out, C_mid // groups2), jnp.float32) * 0.3
    opg1 = C_mid // groups1
    opg2 = ch_out // groups2
    w1d = jax.scipy.linalg.block_diag(
        *[w1_raw[g * opg1:(g + 1) * opg1] for g in range(groups1)])      # (16, 32)
    w2d = jax.scipy.linalg.block_diag(
        *[w2_raw[g * opg2:(g + 1) * opg2] for g in range(groups2)])      # (32, 16)

    gamma1 = 1.0 + 0.1 * jax.random.normal(keys[3], (C_mid,), jnp.float32)
    beta1 = 0.1 * jax.random.normal(keys[4], (C_mid,), jnp.float32)
    gamma2 = 1.0 + 0.1 * jax.random.normal(keys[5], (ch_out,), jnp.float32)
    beta2 = 0.1 * jax.random.normal(keys[6], (ch_out,), jnp.float32)

    wa = jax.random.normal(keys[7], (C_red, ch_out), jnp.float32) * 0.3   # SEM reduce conv
    wb = jax.random.normal(keys[8], (ch_out, C_red), jnp.float32) * 0.3   # SEM expand conv

    out = obatten_forward(x, w1d, gamma1, beta1, w2d, gamma2, beta2, wa, wb)
    out = jax.block_until_ready(out)

    ref = _ref_forward(x, w1d, gamma1, beta1, w2d, gamma2, beta2, wa, wb)
    assert out.shape == ref.shape and out.dtype == ref.dtype
    err = float(jnp.max(jnp.abs(out - ref)))
    assert jnp.allclose(out, ref, atol=1e-2, rtol=1e-2), err

    print("KERNEL_OK")
</pallas_src>

<mosaic_0001>
module attributes {stable_mosaic.version = 11 : i64} {
  func.func @_obatten_kernel(%arg0: i32, %arg1: memref<1x32x256xf32, #tpu.memory_space<vmem>>, %arg2: memref<16x32xf32, #tpu.memory_space<vmem>>, %arg3: memref<16x1xf32, #tpu.memory_space<vmem>>, %arg4: memref<16x1xf32, #tpu.memory_space<vmem>>, %arg5: memref<32x16xf32, #tpu.memory_space<vmem>>, %arg6: memref<32x1xf32, #tpu.memory_space<vmem>>, %arg7: memref<32x1xf32, #tpu.memory_space<vmem>>, %arg8: memref<32x2xf32, #tpu.memory_space<vmem>>, %arg9: memref<32x2xf32, #tpu.memory_space<vmem>>, %arg10: memref<1x32x256xf32, #tpu.memory_space<vmem>>) attributes {dimension_semantics = [#tpu.dimension_semantics<parallel>], iteration_bounds = array<i64: 2>, scalar_prefetch = 0 : i64, scratch_operands = 0 : i64, tpu.core_type = #tpu.core_type<tc>, window_params = [{transform_indices = @transform_0, window_bounds = array<i64: 1, 32, 256>}, {pipeline_mode = #tpu.pipeline_mode<synchronous>, transform_indices = @transform_1, window_bounds = array<i64: 16, 32>}, {pipeline_mode = #tpu.pipeline_mode<synchronous>, transform_indices = @transform_2, window_bounds = array<i64: 16, 1>}, {pipeline_mode = #tpu.pipeline_mode<synchronous>, transform_indices = @transform_3, window_bounds = array<i64: 16, 1>}, {pipeline_mode = #tpu.pipeline_mode<synchronous>, transform_indices = @transform_4, window_bounds = array<i64: 32, 16>}, {pipeline_mode = #tpu.pipeline_mode<synchronous>, transform_indices = @transform_5, window_bounds = array<i64: 32, 1>}, {pipeline_mode = #tpu.pipeline_mode<synchronous>, transform_indices = @transform_6, window_bounds = array<i64: 32, 1>}, {pipeline_mode = #tpu.pipeline_mode<synchronous>, transform_indices = @transform_7, window_bounds = array<i64: 32, 2>}, {pipeline_mode = #tpu.pipeline_mode<synchronous>, transform_indices = @transform_8, window_bounds = array<i64: 32, 2>}, {transform_indices = @transform_9, window_bounds = array<i64: 1, 32, 256>}]} {
    %c0 = arith.constant 0 : index
    %c0_0 = arith.constant 0 : index
    %c0_1 = arith.constant 0 : index
    %0 = vector.load %arg1[%c0, %c0_0, %c0_1] : memref<1x32x256xf32, #tpu.memory_space<vmem>>, vector<1x32x256xf32>
    %1 = vector.shape_cast %0 : vector<1x32x256xf32> to vector<32x256xf32>
    %c0_2 = arith.constant 0 : index
    %c0_3 = arith.constant 0 : index
    %2 = vector.load %arg2[%c0_2, %c0_3] : memref<16x32xf32, #tpu.memory_space<vmem>>, vector<16x32xf32>
    %cst = arith.constant dense<0.000000e+00> : vector<16x256xf32>
    %3 = tpu.matmul %2, %1, %cst {dimension_numbers = #tpu.dot_dimension_numbers<[1], [0], [0], [1], [0, 0, 1, 1], [], []>} : vector<16x32xf32>, vector<32x256xf32>, vector<16x256xf32> -> vector<16x256xf32>
    %c0_4 = arith.constant 0 : index
    %c0_5 = arith.constant 0 : index
    %4 = vector.load %arg3[%c0_4, %c0_5] : memref<16x1xf32, #tpu.memory_space<vmem>>, vector<16x1xf32>
    %c0_6 = arith.constant 0 : index
    %c0_7 = arith.constant 0 : index
    %5 = vector.load %arg4[%c0_6, %c0_7] : memref<16x1xf32, #tpu.memory_space<vmem>>, vector<16x1xf32>
    %6 = vector.extract_strided_slice %3 {offsets = [0, 0], sizes = [8, 256], strides = [1, 1]} : vector<16x256xf32> to vector<8x256xf32>
    %cst_8 = arith.constant dense<0.000000e+00> : vector<8xf32>
    %7 = vector.multi_reduction <add>, %6, %cst_8 [1] : vector<8x256xf32> to vector<8xf32>
    %8 = vector.shape_cast %7 : vector<8xf32> to vector<8x1xf32>
    %cst_9 = arith.constant 2.560000e+02 : f32
    %9 = vector.broadcast %cst_9 : f32 to vector<8x1xf32>
    %10 = arith.divf %8, %9 : vector<8x1xf32>
    %cst_10 = arith.constant dense<0.000000e+00> : vector<1xf32>
    %11 = vector.multi_reduction <add>, %10, %cst_10 [0] : vector<8x1xf32> to vector<1xf32>
    %12 = vector.shape_cast %11 : vector<1xf32> to vector<1x1xf32>
    %cst_11 = arith.constant 8.000000e+00 : f32
    %13 = vector.broadcast %cst_11 : f32 to vector<1x1xf32>
    %14 = arith.divf %12, %13 : vector<1x1xf32>
    %15 = vector.broadcast %14 : vector<1x1xf32> to vector<8x256xf32>
    %16 = arith.subf %6, %15 : vector<8x256xf32>
    %17 = arith.mulf %16, %16 : vector<8x256xf32>
    %cst_12 = arith.constant dense<0.000000e+00> : vector<8xf32>
    %18 = vector.multi_reduction <add>, %17, %cst_12 [1] : vector<8x256xf32> to vector<8xf32>
    %19 = vector.shape_cast %18 : vector<8xf32> to vector<8x1xf32>
    %cst_13 = arith.constant 2.560000e+02 : f32
    %20 = vector.broadcast %cst_13 : f32 to vector<8x1xf32>
    %21 = arith.divf %19, %20 : vector<8x1xf32>
    %cst_14 = arith.constant dense<0.000000e+00> : vector<1xf32>
    %22 = vector.multi_reduction <add>, %21, %cst_14 [0] : vector<8x1xf32> to vector<1xf32>
    %23 = vector.shape_cast %22 : vector<1xf32> to vector<1x1xf32>
    %cst_15 = arith.constant 8.000000e+00 : f32
    %24 = vector.broadcast %cst_15 : f32 to vector<1x1xf32>
    %25 = arith.divf %23, %24 : vector<1x1xf32>
    %cst_16 = arith.constant 9.99999974E-6 : f32
    %26 = vector.broadcast %cst_16 : f32 to vector<1x1xf32>
    %27 = arith.addf %25, %26 : vector<1x1xf32>
    %28 = math.rsqrt %27 : vector<1x1xf32>
    %29 = vector.broadcast %28 : vector<1x1xf32> to vector<8x256xf32>
    %30 = arith.mulf %16, %29 : vector<8x256xf32>
    %31 = vector.extract_strided_slice %3 {offsets = [8, 0], sizes = [8, 256], strides = [1, 1]} : vector<16x256xf32> to vector<8x256xf32>
    %cst_17 = arith.constant dense<0.000000e+00> : vector<8xf32>
    %32 = vector.multi_reduction <add>, %31, %cst_17 [1] : vector<8x256xf32> to vector<8xf32>
    %33 = vector.shape_cast %32 : vector<8xf32> to vector<8x1xf32>
    %cst_18 = arith.constant 2.560000e+02 : f32
    %34 = vector.broadcast %cst_18 : f32 to vector<8x1xf32>
    %35 = arith.divf %33, %34 : vector<8x1xf32>
    %cst_19 = arith.constant dense<0.000000e+00> : vector<1xf32>
    %36 = vector.multi_reduction <add>, %35, %cst_19 [0] : vector<8x1xf32> to vector<1xf32>
    %37 = vector.shape_cast %36 : vector<1xf32> to vector<1x1xf32>
    %cst_20 = arith.constant 8.000000e+00 : f32
    %38 = vector.broadcast %cst_20 : f32 to vector<1x1xf32>
    %39 = arith.divf %37, %38 : vector<1x1xf32>
    %40 = vector.broadcast %39 : vector<1x1xf32> to vector<8x256xf32>
    %41 = arith.subf %31, %40 : vector<8x256xf32>
    %42 = arith.mulf %41, %41 : vector<8x256xf32>
    %cst_21 = arith.constant dense<0.000000e+00> : vector<8xf32>
    %43 = vector.multi_reduction <add>, %42, %cst_21 [1] : vector<8x256xf32> to vector<8xf32>
    %44 = vector.shape_cast %43 : vector<8xf32> to vector<8x1xf32>
    %cst_22 = arith.constant 2.560000e+02 : f32
    %45 = vector.broadcast %cst_22 : f32 to vector<8x1xf32>
    %46 = arith.divf %44, %45 : vector<8x1xf32>
    %cst_23 = arith.constant dense<0.000000e+00> : vector<1xf32>
    %47 = vector.multi_reduction <add>, %46, %cst_23 [0] : vector<8x1xf32> to vector<1xf32>
    %48 = vector.shape_cast %47 : vector<1xf32> to vector<1x1xf32>
    %cst_24 = arith.constant 8.000000e+00 : f32
    %49 = vector.broadcast %cst_24 : f32 to vector<1x1xf32>
    %50 = arith.divf %48, %49 : vector<1x1xf32>
    %cst_25 = arith.constant 9.99999974E-6 : f32
    %51 = vector.broadcast %cst_25 : f32 to vector<1x1xf32>
    %52 = arith.addf %50, %51 : vector<1x1xf32>
    %53 = math.rsqrt %52 : vector<1x1xf32>
    %54 = vector.broadcast %53 : vector<1x1xf32> to vector<8x256xf32>
    %55 = arith.mulf %41, %54 : vector<8x256xf32>
    %56 = tpu.concatenate %30, %55 in 0 : vector<8x256xf32>, vector<8x256xf32> -> vector<16x256xf32>
    %57 = vector.broadcast %4 : vector<16x1xf32> to vector<16x256xf32>
    %58 = arith.mulf %56, %57 : vector<16x256xf32>
    %59 = vector.broadcast %5 : vector<16x1xf32> to vector<16x256xf32>
    %60 = arith.addf %58, %59 : vector<16x256xf32>
    %c0_26 = arith.constant 0 : index
    %c0_27 = arith.constant 0 : index
    %61 = vector.load %arg5[%c0_26, %c0_27] : memref<32x16xf32, #tpu.memory_space<vmem>>, vector<32x16xf32>
    %cst_28 = arith.constant dense<0.000000e+00> : vector<32x256xf32>
    %62 = tpu.matmul %61, %60, %cst_28 {dimension_numbers = #tpu.dot_dimension_numbers<[1], [0], [0], [1], [0, 0, 1, 1], [], []>} : vector<32x16xf32>, vector<16x256xf32>, vector<32x256xf32> -> vector<32x256xf32>
    %c0_29 = arith.constant 0 : index
    %c0_30 = arith.constant 0 : index
    %63 = vector.load %arg6[%c0_29, %c0_30] : memref<32x1xf32, #tpu.memory_space<vmem>>, vector<32x1xf32>
    %c0_31 = arith.constant 0 : index
    %c0_32 = arith.constant 0 : index
    %64 = vector.load %arg7[%c0_31, %c0_32] : memref<32x1xf32, #tpu.memory_space<vmem>>, vector<32x1xf32>
    %65 = vector.extract_strided_slice %62 {offsets = [0, 0], sizes = [16, 256], strides = [1, 1]} : vector<32x256xf32> to vector<16x256xf32>
    %cst_33 = arith.constant dense<0.000000e+00> : vector<16xf32>
    %66 = vector.multi_reduction <add>, %65, %cst_33 [1] : vector<16x256xf32> to vector<16xf32>
    %67 = vector.shape_cast %66 : vector<16xf32> to vector<16x1xf32>
    %cst_34 = arith.constant 2.560000e+02 : f32
    %68 = vector.broadcast %cst_34 : f32 to vector<16x1xf32>
    %69 = arith.divf %67, %68 : vector<16x1xf32>
    %cst_35 = arith.constant dense<0.000000e+00> : vector<1xf32>
    %70 = vector.multi_reduction <add>, %69, %cst_35 [0] : vector<16x1xf32> to vector<1xf32>
    %71 = vector.shape_cast %70 : vector<1xf32> to vector<1x1xf32>
    %cst_36 = arith.constant 1.600000e+01 : f32
    %72 = vector.broadcast %cst_36 : f32 to vector<1x1xf32>
    %73 = arith.divf %71, %72 : vector<1x1xf32>
    %74 = vector.broadcast %73 : vector<1x1xf32> to vector<16x256xf32>
    %75 = arith.subf %65, %74 : vector<16x256xf32>
    %76 = arith.mulf %75, %75 : vector<16x256xf32>
    %cst_37 = arith.constant dense<0.000000e+00> : vector<16xf32>
    %77 = vector.multi_reduction <add>, %76, %cst_37 [1] : vector<16x256xf32> to vector<16xf32>
    %78 = vector.shape_cast %77 : vector<16xf32> to vector<16x1xf32>
    %cst_38 = arith.constant 2.560000e+02 : f32
    %79 = vector.broadcast %cst_38 : f32 to vector<16x1xf32>
    %80 = arith.divf %78, %79 : vector<16x1xf32>
    %cst_39 = arith.constant dense<0.000000e+00> : vector<1xf32>
    %81 = vector.multi_reduction <add>, %80, %cst_39 [0] : vector<16x1xf32> to vector<1xf32>
    %82 = vector.shape_cast %81 : vector<1xf32> to vector<1x1xf32>
    %cst_40 = arith.constant 1.600000e+01 : f32
    %83 = vector.broadcast %cst_40 : f32 to vector<1x1xf32>
    %84 = arith.divf %82, %83 : vector<1x1xf32>
    %cst_41 = arith.constant 9.99999974E-6 : f32
    %85 = vector.broadcast %cst_41 : f32 to vector<1x1xf32>
    %86 = arith.addf %84, %85 : vector<1x1xf32>
    %87 = math.rsqrt %86 : vector<1x1xf32>
    %88 = vector.broadcast %87 : vector<1x1xf32> to vector<16x256xf32>
    %89 = arith.mulf %75, %88 : vector<16x256xf32>
    %90 = vector.extract_strided_slice %62 {offsets = [16, 0], sizes = [16, 256], strides = [1, 1]} : vector<32x256xf32> to vector<16x256xf32>
    %cst_42 = arith.constant dense<0.000000e+00> : vector<16xf32>
    %91 = vector.multi_reduction <add>, %90, %cst_42 [1] : vector<16x256xf32> to vector<16xf32>
    %92 = vector.shape_cast %91 : vector<16xf32> to vector<16x1xf32>
    %cst_43 = arith.constant 2.560000e+02 : f32
    %93 = vector.broadcast %cst_43 : f32 to vector<16x1xf32>
    %94 = arith.divf %92, %93 : vector<16x1xf32>
    %cst_44 = arith.constant dense<0.000000e+00> : vector<1xf32>
    %95 = vector.multi_reduction <add>, %94, %cst_44 [0] : vector<16x1xf32> to vector<1xf32>
    %96 = vector.shape_cast %95 : vector<1xf32> to vector<1x1xf32>
    %cst_45 = arith.constant 1.600000e+01 : f32
    %97 = vector.broadcast %cst_45 : f32 to vector<1x1xf32>
    %98 = arith.divf %96, %97 : vector<1x1xf32>
    %99 = vector.broadcast %98 : vector<1x1xf32> to vector<16x256xf32>
    %100 = arith.subf %90, %99 : vector<16x256xf32>
    %101 = arith.mulf %100, %100 : vector<16x256xf32>
    %cst_46 = arith.constant dense<0.000000e+00> : vector<16xf32>
    %102 = vector.multi_reduction <add>, %101, %cst_46 [1] : vector<16x256xf32> to vector<16xf32>
    %103 = vector.shape_cast %102 : vector<16xf32> to vector<16x1xf32>
    %cst_47 = arith.constant 2.560000e+02 : f32
    %104 = vector.broadcast %cst_47 : f32 to vector<16x1xf32>
    %105 = arith.divf %103, %104 : vector<16x1xf32>
    %cst_48 = arith.constant dense<0.000000e+00> : vector<1xf32>
    %106 = vector.multi_reduction <add>, %105, %cst_48 [0] : vector<16x1xf32> to vector<1xf32>
    %107 = vector.shape_cast %106 : vector<1xf32> to vector<1x1xf32>
    %cst_49 = arith.constant 1.600000e+01 : f32
    %108 = vector.broadcast %cst_49 : f32 to vector<1x1xf32>
    %109 = arith.divf %107, %108 : vector<1x1xf32>
    %cst_50 = arith.constant 9.99999974E-6 : f32
    %110 = vector.broadcast %cst_50 : f32 to vector<1x1xf32>
    %111 = arith.addf %109, %110 : vector<1x1xf32>
    %112 = math.rsqrt %111 : vector<1x1xf32>
    %113 = vector.broadcast %112 : vector<1x1xf32> to vector<16x256xf32>
    %114 = arith.mulf %100, %113 : vector<16x256xf32>
    %115 = tpu.concatenate %89, %114 in 0 : vector<16x256xf32>, vector<16x256xf32> -> vector<32x256xf32>
    %116 = vector.broadcast %63 : vector<32x1xf32> to vector<32x256xf32>
    %117 = arith.mulf %115, %116 : vector<32x256xf32>
    %118 = vector.broadcast %64 : vector<32x1xf32> to vector<32x256xf32>
    %119 = arith.addf %117, %118 : vector<32x256xf32>
    %cst_51 = arith.constant dense<0.000000e+00> : vector<32xf32>
    %120 = vector.multi_reduction <add>, %119, %cst_51 [1] : vector<32x256xf32> to vector<32xf32>
    %121 = vector.shape_cast %120 : vector<32xf32> to vector<32x1xf32>
    %cst_52 = arith.constant 2.560000e+02 : f32
    %122 = vector.broadcast %cst_52 : f32 to vector<32x1xf32>
    %123 = arith.divf %121, %122 : vector<32x1xf32>
    %c0_53 = arith.constant 0 : index
    %c0_54 = arith.constant 0 : index
    %124 = vector.load %arg8[%c0_53, %c0_54] : memref<32x2xf32, #tpu.memory_space<vmem>>, vector<32x2xf32>
    %125 = vector.broadcast %123 : vector<32x1xf32> to vector<32x2xf32>
    %126 = arith.mulf %124, %125 : vector<32x2xf32>
    %cst_55 = arith.constant dense<0.000000e+00> : vector<2xf32>
    %127 = vector.multi_reduction <add>, %126, %cst_55 [0] : vector<32x2xf32> to vector<2xf32>
    %128 = vector.shape_cast %127 : vector<2xf32> to vector<1x2xf32>
    %cst_56 = arith.constant 0.000000e+00 : f32
    %129 = vector.broadcast %cst_56 : f32 to vector<1x2xf32>
    %130 = arith.maximumf %128, %129 : vector<1x2xf32>
    %c0_57 = arith.constant 0 : index
    %c0_58 = arith.constant 0 : index
    %131 = vector.load %arg9[%c0_57, %c0_58] : memref<32x2xf32, #tpu.memory_space<vmem>>, vector<32x2xf32>
    %132 = vector.broadcast %130 : vector<1x2xf32> to vector<32x2xf32>
    %133 = arith.mulf %131, %132 : vector<32x2xf32>
    %cst_59 = arith.constant dense<0.000000e+00> : vector<32xf32>
    %134 = vector.multi_reduction <add>, %133, %cst_59 [1] : vector<32x2xf32> to vector<32xf32>
    %135 = vector.shape_cast %134 : vector<32xf32> to vector<32x1xf32>
    %cst_60 = arith.constant 0.000000e+00 : f32
    %136 = vector.broadcast %cst_60 : f32 to vector<32x1xf32>
    %137 = arith.subf %136, %135 : vector<32x1xf32>
    %138 = math.exp %137 : vector<32x1xf32>
    %cst_61 = arith.constant 1.000000e+00 : f32
    %139 = vector.broadcast %cst_61 : f32 to vector<32x1xf32>
    %140 = arith.addf %139, %138 : vector<32x1xf32>
    %cst_62 = arith.constant 1.000000e+00 : f32
    %141 = vector.broadcast %cst_62 : f32 to vector<32x1xf32>
    %142 = arith.divf %141, %140 : vector<32x1xf32>
    %cst_63 = arith.constant 1.000000e+00 : f32
    %143 = vector.broadcast %cst_63 : f32 to vector<32x1xf32>
    %144 = arith.addf %143, %142 : vector<32x1xf32>
    %145 = vector.broadcast %144 : vector<32x1xf32> to vector<32x256xf32>
    %146 = arith.mulf %119, %145 : vector<32x256xf32>
    %147 = arith.addf %1, %146 : vector<32x256xf32>
    %cst_64 = arith.constant 0.000000e+00 : f32
    %148 = vector.broadcast %cst_64 : f32 to vector<32x256xf32>
    %149 = arith.maximumf %147, %148 : vector<32x256xf32>
    %c0_65 = arith.constant 0 : index
    %c0_66 = arith.constant 0 : index
    %c0_67 = arith.constant 0 : index
    %150 = vector.load %arg10[%c0_65, %c0_66, %c0_67] : memref<1x32x256xf32, #tpu.memory_space<vmem>>, vector<1x32x256xf32>
    %151 = vector.shape_cast %150 : vector<1x32x256xf32> to vector<32x256xf32>
    %152 = vector.shape_cast %149 : vector<32x256xf32> to vector<1x32x256xf32>
    tpu.vector_store %arg10[%c0_65, %c0_66, %c0_67], %152 {strides = array<i32>} : memref<1x32x256xf32, #tpu.memory_space<vmem>>, vector<1x32x256xf32>,
    return
  }
  func.func @transform_0(%arg0: i32) -> (i32, i32, i32) {
    %c0_i32 = arith.constant 0 : i32
    %c0_i32_0 = arith.constant 0 : i32
    %c0_i32_1 = arith.constant 0 : i32
    return %arg0, %c0_i32, %c0_i32_0 : i32, i32, i32
  }
  func.func @transform_1(%arg0: i32) -> (i32, i32) {
    %c0_i32 = arith.constant 0 : i32
    %c0_i32_0 = arith.constant 0 : i32
    %c0_i32_1 = arith.constant 0 : i32
    return %c0_i32, %c0_i32_0 : i32, i32
  }
  func.func @transform_2(%arg0: i32) -> (i32, i32) {
    %c0_i32 = arith.constant 0 : i32
    %c0_i32_0 = arith.constant 0 : i32
    %c0_i32_1 = arith.constant 0 : i32
    return %c0_i32, %c0_i32_0 : i32, i32
  }
  func.func @transform_3(%arg0: i32) -> (i32, i32) {
    %c0_i32 = arith.constant 0 : i32
    %c0_i32_0 = arith.constant 0 : i32
    %c0_i32_1 = arith.constant 0 : i32
    return %c0_i32, %c0_i32_0 : i32, i32
  }
  func.func @transform_4(%arg0: i32) -> (i32, i32) {
    %c0_i32 = arith.constant 0 : i32
    %c0_i32_0 = arith.constant 0 : i32
    %c0_i32_1 = arith.constant 0 : i32
    return %c0_i32, %c0_i32_0 : i32, i32
  }
  func.func @transform_5(%arg0: i32) -> (i32, i32) {
    %c0_i32 = arith.constant 0 : i32
    %c0_i32_0 = arith.constant 0 : i32
    %c0_i32_1 = arith.constant 0 : i32
    return %c0_i32, %c0_i32_0 : i32, i32
  }
  func.func @transform_6(%arg0: i32) -> (i32, i32) {
    %c0_i32 = arith.constant 0 : i32
    %c0_i32_0 = arith.constant 0 : i32
    %c0_i32_1 = arith.constant 0 : i32
    return %c0_i32, %c0_i32_0 : i32, i32
  }
  func.func @transform_7(%arg0: i32) -> (i32, i32) {
    %c0_i32 = arith.constant 0 : i32
    %c0_i32_0 = arith.constant 0 : i32
    %c0_i32_1 = arith.constant 0 : i32
    return %c0_i32, %c0_i32_0 : i32, i32
  }
  func.func @transform_8(%arg0: i32) -> (i32, i32) {
    %c0_i32 = arith.constant 0 : i32
    %c0_i32_0 = arith.constant 0 : i32
    %c0_i32_1 = arith.constant 0 : i32
    return %c0_i32, %c0_i32_0 : i32, i32
  }
  func.func @transform_9(%arg0: i32) -> (i32, i32, i32) {
    %c0_i32 = arith.constant 0 : i32
    %c0_i32_0 = arith.constant 0 : i32
    %c0_i32_1 = arith.constant 0 : i32
    return %arg0, %c0_i32, %c0_i32_0 : i32, i32, i32
  }
}

</mosaic_0001>

<bundles_post_ra>
// kernel: tpu_custom_call.1
= control target key start
LH: loop header
LB: loop body
LE: loop exit
PB: predicated region body
PF: predicated region fallthrough
CT: control target
= control target key end

     0   :  { %14 = vsyncpa [#allocation3], 0  ;;  %s1490_s0 = inlined_call_operand.vmem [shape: f32[2,32,256], index: 0, kind: input, shape index: {}]   ;;  %s1491_s1 = inlined_call_operand.vmem [shape: f32[16,32], index: 1, kind: input, shape index: {}]   ;;  %s1492_s2 = inlined_call_operand.vmem [shape: f32[16,1], index: 2, kind: input, shape index: {}]   ;;  %s1493_s3 = inlined_call_operand.vmem [shape: f32[16,1], index: 3, kind: input, shape index: {}]   ;;  %s1494_s4 = inlined_call_operand.vmem [shape: f32[32,16], index: 4, kind: input, shape index: {}]   ;;  %s1495_s5 = inlined_call_operand.vmem [shape: f32[32,1], index: 5, kind: input, shape index: {}]   ;;  %s1496_s6 = inlined_call_operand.vmem [shape: f32[32,1], index: 6, kind: input, shape index: {}]   ;;  %s1497_s7 = inlined_call_operand.vmem [shape: f32[32,2], index: 7, kind: input, shape index: {}]   ;;  %s1498_s8 = inlined_call_operand.vmem [shape: f32[32,2], index: 8, kind: input, shape index: {}]   ;;  %s1499_s9 = inlined_call_operand.hbm [shape: f32[2,32,256], index: 9, kind: output, shape index: {}]  }
   0x1   :  { %16 = vsyncpa [#allocation3 + $0x1], 0  ;;  %s1197_s30 = smov 0   ;;  %s1199_s10 = smov 0  }
   0x2   :  { %s1201_s11 = smov 0   ;;  %s1203_s12 = smov 0  }
   0x3 LB: > { %s1218_s13 = sadd.s32 4294967295, %s1140_s12   ;;  %s977_s14 = sadd.s32 4294967294, %s1140_s12   ;;  %s1140_s12 = sphi %s1203_s12, %s1505_s12   ;;  %s1136_s11 = sphi %s1201_s11, %s1504_s11   ;;  %s1132_s10 = sphi %s1199_s10, %s1503_s10   ;;  %s1128_s30 = sphi %s1197_s30, %s1502_s30  }
   0x4   : > { %s1222_s15 = sadd.s32 1, %s1140_s12   ;;  %s223_s16 = sadd.s32 1, %s1136_s11 }
   0x5   : > { %s220_s17 = ssub.s32 %s1140_s12, %s1222_s15  ;;  %p233_p0 = scmp.ne.s32.totalorder %s1136_s11, %s1132_s10 }
   0x6   : > { %p221_p1 = scmp.eq.s32.totalorder %s220_s17, 0  ;;  %p234_p2 = scmp.eq.s32.totalorder %s1218_s13, 1 }
   0x7   : > { %p239_p3 = scmp.ne.s32.totalorder %s1132_s10, %s1128_s30  ;;  %p240_p4 = scmp.eq.s32.totalorder %s977_s14, 1 }
   0x8   : > { %s1233_s18 = scalar_select %p221_p1, %s1136_s11, %s223_s16  }
   0x9   : > { %p1235_p5 = por %p234_p2, %p233_p0  ;;  %p1239_p6 = por %p240_p4, %p239_p3 }
   0xa   : > { %p980_p7 = scmp.ge.s32.totalorder %s1140_s12, 1  ;;  %p290_p8 = scmp.lt.s32.totalorder %s1140_s12, 3 }
   0xc   : > { %p291_p9 = pnand %p980_p7, %p290_p8 }
   0xd   : > { %p326_p10 = scmp.lt.s32.totalorder (!%p291_p9), %s1218_s13, 1  ;;  %v1142_v0 = vmov (!%p291_p9), 0.0   ;;  %v339_v13 = vld [vmem:[%s1491_s1] sm:$0xff] (!%p291_p9)  ;;  %vm341_vm0 = vcmask (!%p291_p9), 261120   ;;  %v340_v14 = vld [vmem:[%s1491_s1 + $0x8] sm:$0xff] (!%p291_p9)  ;;  %v1143_v16 = vmov (!%p291_p9), 0  }
   0xe   : > { %294 = sbr.rel (%p291_p9) target bundleno = 1591 (0x637), region = 56  ;;  %412 = vmatprep.mubr.f32.mxu0 (!%p291_p9), %v1142_v0  ;;  %600 = vmatprep.mubr.f32.mxu1 (!%p291_p9), %v1142_v0  ;;  %v426_v15 = vld [vmem:[%s1492_s2 + $0x8] sm:$0xff] (!%p291_p9)  ;;  %v425_v23 = vld [vmem:[%s1492_s2] sm:$0xff] (!%p291_p9)  ;;  %vm523_vm1 = vcmask (!%p291_p9), 130048   ;;  %vm806_vm2 = vcmask (!%p291_p9), 15360   ;;  %s323_s14 = sand.u32 (!%p291_p9), 1, %s1132_s10  }
   0xf   : > { %1053 = vset.pattern.permute.xlu1 (!%p291_p9), %v1143_v16  ;;  %1052 = vset.pattern.permute.xlu0 (!%p291_p9), %v1143_v16  ;;  %v427_v52 = vld [vmem:[%s1493_s3] sm:$0xff] (!%p291_p9)  ;;  %v428_v53 = vld [vmem:[%s1493_s3 + $0x8] sm:$0xff] (!%p291_p9)  ;;  %s981_s16 = sshll.u32 (!%p291_p9), %s323_s14, 6  ;;  %s996_s17 = sshll.u32 (!%p291_p9), %s1218_s13, 10 }
  0x10   : > { %498 = vperm.xlu1 (!%p291_p9), %1053, %v426_v15   ;;  %s1443_s24 = scalar_lea.hbm (!%p291_p9), %s1499_s9, %s996_s17  ;;  %s1144_s27 = smov (!%p291_p9), [#allocation2]  }
  0x11   : > { %s1082_s28 = sshll.u32 (!%p291_p9), %s1144_s27, 4  ;;  %s1083_s28 = int_to_ptr.vmem [resolvable:$false] %s1082_s28 }
  0x12   : > { %s1084_s29 = scalar_lea.vmem (!%p291_p9), %s1083_s28, 2048 }
  0x15   : > { %s327_s21 = scalar_select %p326_p10, %s1218_s13, 1 }
  0x17   : > { %s995_s22 = sshll.u32 %s327_s21, 6  ;;  %s325_s21 = scalar_lea.vmem [#allocation2], %s981_s16 }
  0x18   : > { %s330_s25 = scalar_lea.vmem %s1490_s0, %s995_s22  ;;  %s915_s22 = sshll.u32 %s325_s21, 4  ;;  %s1445_s22 = int_to_ptr.vmem [resolvable:$true] %s915_s22 }
  0x19   : > { %v1252_v1 = vld [vmem:[%s330_s25 + $0x8] sm:$0xff]  ;;  %v1254_v2 = vld [vmem:[%s330_s25 + $0x18] sm:$0xff]  ;;  %v1256_v3 = vld [vmem:[%s330_s25] sm:$0xff]  ;;  %s1078_s26 = scalar_lea.vmem %s1445_s22, 1024  ;;  %p1085_p0 = scmp.lt.s32.totalorder %s1445_s22, %s1083_s28 }
  0x1a   : > { %v997_v4 = vpack.c.bf16 %v1254_v2, %v1252_v1  ;;  %v1260_v5 = vld [vmem:[%s330_s25 + $0x10] sm:$0xff]  ;;  %v1262_v6 = vld [vmem:[%s330_s25 + $0x28] sm:$0xff]  ;;  %v1264_v7 = vld [vmem:[%s330_s25 + $0x38] sm:$0xff]  ;;  %p1079_p11 = scmp.ne.s32.totalorder %s1445_s22, %s1078_s26  ;;  %p1086_p1 = scmp.lt.s32.totalorder %s1084_s29, %s1078_s26 }
  0x1b   : > { %v999_v8 = vpack.c.bf16 %v1260_v5, %v1256_v3  ;;  %v1001_v9 = vpack.c.bf16 %v1264_v7, %v1262_v6  ;;  %v1270_v10 = vld [vmem:[%s330_s25 + $0x20] sm:$0xff]  ;;  %v1272_v11 = vld [vmem:[%s330_s25 + $0x30] sm:$0xff]  ;;  %s1449_s25 = scalar_lea.sflag [#allocation3], %s323_s14 }
  0x1c   : > { %998 = vmatprep.subr.bf16.mxu0 %v997_v4  ;;  %v1003_v12 = vpack.c.bf16 %v1272_v11, %v1270_v10  ;;  %p1080_p12 = pnand %p1079_p11, %p1235_p5  ;;  %p1087_p2 = por %p1086_p1, %p1085_p0 }
  0x1d   : > { %1000 = vmatpush1.bf16.msra.mxu0 %v999_v8 }
  0x1e   : > { %1002 = vmatprep.subr.bf16.mxu0 %v1001_v9  ;;  %p1081_p13 = pneg %p1080_p12 }
  0x20   : > { %p1088_p3 = pnand %p1087_p2, %p1081_p13 }
  0x21   : > { %1004 = vmatpush1.bf16.msra.mxu0 %v1003_v12 }
  0x24   : > { %984 = vmatmul.mubr.msk.f32.vlgmr.msra.gmra.mrb[0].mxu0 %vm341_vm0, %v339_v13 }
  0x25   : > { %418 = vmatprep.mubr.f32.mxu0 %v1142_v0 }
  0x28   : > { %985 = vmatmul.mubr.msk.f32.gmra.mrb[2].mxu0 %vm341_vm0, %v340_v14 }
  0x8f   : > { %v499_v54 = vpop.permute.xlu1 %498 }
  0xf7   : > { %v414_v17 = vpop.f32.mrb[0].mxu0 }
  0xf8   : > { %v416_v18 = vpop.f32.mrb[1].mxu0 }
  0xf9   : > { %v429_v19 = vadd.f32 %v416_v18, %v414_v17 }
  0xfb   : > { %430 = vadd.xlane.f32.xlu0 %v429_v19  ;;  %v420_v20 = vpop.f32.mrb[2].mxu0 }
  0xfc   : > { %v422_v21 = vpop.f32.mrb[3].mxu0 }
  0xfd   : > { %v461_v22 = vadd.f32 %v422_v21, %v420_v20 }
  0xff   : > { %462 = vadd.xlane.f32.xlu0 %v461_v22 }
 0x115   : > { %493 = vperm.xlu0 %1052, %v425_v23  }
 0x188   : > { %v431_v24 = vpop.xlane.xlu0 %430 }
 0x189   : > { %v433_v25 = vmul.f32 0.00390625, %v431_v24 }
 0x18b   : > { %v434_v26 = vrot.slane %v433_v25, 4 }
 0x18c   : > { %v463_v27 = vpop.xlane.xlu0 %462 }
 0x18d   : > { %v435_v28 = vadd.f32 %v434_v26, %v433_v25  ;;  %v464_v29 = vmul.f32 0.00390625, %v463_v27 }
 0x18f   : > { %v436_v30 = vrot.slane %v435_v28, 2  ;;  %v465_v31 = vrot.slane %v464_v29, 4 }
 0x191   : > { %v437_v32 = vadd.f32 %v436_v30, %v435_v28  ;;  %v466_v33 = vadd.f32 %v465_v31, %v464_v29 }
 0x193   : > { %v438_v34 = vrot.slane %v437_v32, 1  ;;  %v467_v35 = vrot.slane %v466_v33, 2 }
 0x194   : > { %v494_v24 = vpop.permute.xlu0 %493 }
 0x195   : > { %v439_v36 = vadd.f32 %v438_v34, %v437_v32  ;;  %v468_v37 = vadd.f32 %v467_v35, %v466_v33 }
 0x197   : > { %v441_v38 = vmul.f32 0.125, %v439_v36  ;;  %v469_v39 = vrot.slane %v468_v37, 1 }
 0x199   : > { %v470_v40 = vadd.f32 %v469_v39, %v468_v37  ;;  %v442_v41 = vsub.f32 %v414_v17, %v441_v38  ;;  %v443_v42 = vsub.f32 %v416_v18, %v441_v38  ;;  %v519_v39 = vld [vmem:[%s1494_s4] sm:$0xff] }
 0x19b   : > { %v471_v43 = vmul.f32 0.125, %v470_v40  ;;  %v444_v44 = vmul.f32 %v442_v41, %v442_v41  ;;  %v445_v45 = vmul.f32 %v443_v42, %v443_v42  ;;  %v520_v40 = vld [vmem:[%s1494_s4 + $0x8] sm:$0xff] }
 0x19d   : > { %v446_v46 = vadd.f32 %v445_v45, %v444_v44  ;;  %v472_v47 = vsub.f32 %v420_v20, %v471_v43  ;;  %v473_v48 = vsub.f32 %v422_v21, %v471_v43 }
 0x19f   : > { %447 = vadd.xlane.f32.xlu1 %v446_v46  ;;  %v474_v49 = vmul.f32 %v472_v47, %v472_v47  ;;  %v475_v50 = vmul.f32 %v473_v48, %v473_v48 }
 0x1a1   : > { %v476_v51 = vadd.f32 %v475_v50, %v474_v49 }
 0x1a3   : > { %477 = vadd.xlane.f32.xlu1 %v476_v51 }
 0x1b4   : > { %507 = vperm.xlu1 %1053, %v427_v52  }
 0x1b8   : > { %512 = vperm.xlu1 %1053, %v428_v53  }
 0x22c   : > { %v448_v55 = vpop.xlane.xlu1 %447 }
 0x22d   : > { %v449_v56 = vmul.f32 0.00390625, %v448_v55 }
 0x22f   : > { %v450_v57 = vrot.slane %v449_v56, 4 }
 0x230   : > { %v478_v58 = vpop.xlane.xlu1 %477 }
 0x231   : > { %v451_v59 = vadd.f32 %v450_v57, %v449_v56  ;;  %v479_v60 = vmul.f32 0.00390625, %v478_v58 }
 0x233   : > { %v452_v61 = vrot.slane %v451_v59, 2  ;;  %v480_v62 = vrot.slane %v479_v60, 4 }
 0x234   : > { %v508_v23 = vpop.permute.xlu1 %507 }
 0x235   : > { %v453_v63 = vadd.f32 %v452_v61, %v451_v59  ;;  %v481_v4 = vadd.f32 %v480_v62, %v479_v60 }
 0x237   : > { %v454_v8 = vrot.slane %v453_v63, 1  ;;  %v482_v9 = vrot.slane %v481_v4, 2 }
 0x238   : > { %v513_v32 = vpop.permute.xlu1 %512 }
 0x239   : > { %v455_v12 = vadd.f32 %v454_v8, %v453_v63  ;;  %v483_v13 = vadd.f32 %v482_v9, %v481_v4 }
 0x23b   : > { %v456_v14 = vmul.f32 0.125, %v455_v12  ;;  %v484_v15 = vrot.slane %v483_v13, 1 }
 0x23d   : > { %v457_v16 = vadd.f32 1e-05, %v456_v14  ;;  %v485_v17 = vadd.f32 %v484_v15, %v483_v13 }
 0x23f   : > { %1054 = vrsqrt.f32 %v457_v16  ;;  %v486_v18 = vmul.f32 0.125, %v485_v17 }
 0x241   : > { %v487_v19 = vadd.f32 1e-05, %v486_v18 }
 0x243   : > { %1056 = vrsqrt.f32 %v487_v19 }
 0x249   : > { %v1055_v20 = vpop.eup %1054 }
 0x24a   : > { %v459_v21 = vmul.f32 %v1055_v20, %v442_v41  ;;  %v460_v22 = vmul.f32 %v1055_v20, %v443_v42  ;;  %v521_v41 = vld [vmem:[%s1494_s4 + $0x10] sm:$0xff]  ;;  %v522_v42 = vld [vmem:[%s1494_s4 + $0x18] sm:$0xff] }
 0x24c   : > { %v501_v28 = vmul.f32 %v494_v24, %v459_v21  ;;  %v502_v29 = vmul.f32 %v494_v24, %v460_v22 }
 0x24d   : > { %v1057_v25 = vpop.eup %1056 }
 0x24e   : > { %v489_v26 = vmul.f32 %v1057_v25, %v472_v47  ;;  %v490_v27 = vmul.f32 %v1057_v25, %v473_v48  ;;  %v516_v35 = vadd.f32 %v508_v23, %v502_v29  ;;  %v515_v36 = vadd.f32 %v508_v23, %v501_v28 }
 0x250   : > { %v503_v30 = vmul.f32 %v499_v54, %v489_v26  ;;  %v504_v31 = vmul.f32 %v499_v54, %v490_v27 }
 0x252   : > { %v517_v33 = vadd.f32 %v513_v32, %v503_v30  ;;  %v518_v34 = vadd.f32 %v513_v32, %v504_v31 }
 0x254   : > { %v1005_v37 = vpack.c.bf16 %v518_v34, %v516_v35  ;;  %v1007_v38 = vpack.c.bf16 %v517_v33, %v515_v36 }
 0x256   : > { %1006 = vmatprep.subr.bf16.mxu1 %v1005_v37 }
 0x257   : > { %1008 = vmatpush1.bf16.msra.mxu1 %v1007_v38  ;;  %v626_v38 = vld [vmem:[%s1495_s5 + $0x8] sm:$0xff] }
 0x25a   : > { %986 = vmatmul.mubr.msk.f32.vlgmr.msra.gmra.mrb[0].mxu1 %vm523_vm1, %v519_v39  ;;  %v625_v39 = vld [vmem:[%s1495_s5] sm:$0xff] }
 0x25b   : > { %606 = vmatprep.mubr.f32.mxu1 %v1142_v0 }
 0x25e   : > { %987 = vmatmul.mubr.msk.f32.gmra.mrb[2].mxu1 %vm523_vm1, %v520_v40  ;;  %v629_v40 = vld [vmem:[%s1496_s6] sm:$0xff] }
 0x25f   : > { %612 = vmatprep.mubr.f32.mxu1 %v1142_v0 }
 0x262   : > { %988 = vmatmul.mubr.msk.f32.gmra.mrb[4].mxu1 %vm523_vm1, %v521_v41  ;;  %v628_v41 = vld [vmem:[%s1495_s5 + $0x18] sm:$0xff] }
 0x263   : > { %618 = vmatprep.mubr.f32.mxu1 %v1142_v0 }
 0x266   : > { %989 = vmatmul.mubr.msk.f32.gmra.mrb[6].mxu1 %vm523_vm1, %v522_v42  ;;  %v632_v42 = vld [vmem:[%s1496_s6 + $0x18] sm:$0xff] }
 0x32d   : > { %v602_v43 = vpop.f32.mrb[0].mxu1 }
 0x32e   : > { %v604_v44 = vpop.f32.mrb[1].mxu1 }
 0x32f   : > { %v633_v45 = vadd.f32 %v604_v44, %v602_v43 }
 0x331   : > { %634 = vadd.xlane.f32.xlu1 %v633_v45  ;;  %v608_v46 = vpop.f32.mrb[2].mxu1 }
 0x332   : > { %v610_v47 = vpop.f32.mrb[3].mxu1 }
 0x333   : > { %v636_v48 = vadd.f32 %v610_v47, %v608_v46 }
 0x335   : > { %637 = vadd.xlane.f32.xlu0 %v636_v48  ;;  %v614_v49 = vpop.f32.mrb[4].mxu1  ;;  %v627_v48 = vld [vmem:[%s1495_s5 + $0x10] sm:$0xff] }
 0x336   : > { %v616_v50 = vpop.f32.mrb[5].mxu1 }
 0x337   : > { %v680_v51 = vadd.f32 %v616_v50, %v614_v49 }
 0x339   : > { %681 = vadd.xlane.f32.xlu1 %v680_v51  ;;  %v620_v52 = vpop.f32.mrb[6].mxu1 }
 0x33a   : > { %v622_v53 = vpop.f32.mrb[7].mxu1 }
 0x33b   : > { %v683_v0 = vadd.f32 %v622_v53, %v620_v52 }
 0x33d   : > { %684 = vadd.xlane.f32.xlu1 %v683_v0 }
 0x3be   : > { %v635_v54 = vpop.xlane.xlu1 %634 }
 0x3bf   : > { %v639_v56 = vmul.f32 0.00390625, %v635_v54 }
 0x3c2   : > { %v638_v55 = vpop.xlane.xlu0 %637 }
 0x3c3   : > { %v640_v57 = vmul.f32 0.00390625, %v638_v55 }
 0x3c5   : > { %v641_v58 = vadd.f32 %v640_v57, %v639_v56 }
 0x3c6   : > { %v682_v59 = vpop.xlane.xlu1 %681 }
 0x3c7   : > { %v642_v60 = vrot.slane %v641_v58, 4  ;;  %v686_v62 = vmul.f32 0.00390625, %v682_v59 }
 0x3c9   : > { %v643_v61 = vadd.f32 %v642_v60, %v641_v58 }
 0x3ca   : > { %v685_v63 = vpop.xlane.xlu1 %684 }
 0x3cb   : > { %v644_v4 = vrot.slane %v643_v61, 2  ;;  %v687_v8 = vmul.f32 0.00390625, %v685_v63 }
 0x3cd   : > { %v645_v9 = vadd.f32 %v644_v4, %v643_v61  ;;  %v688_v12 = vadd.f32 %v687_v8, %v686_v62 }
 0x3cf   : > { %v646_v13 = vrot.slane %v645_v9, 1  ;;  %v689_v14 = vrot.slane %v688_v12, 4 }
 0x3d1   : > { %v647_v15 = vadd.f32 %v646_v13, %v645_v9  ;;  %v690_v16 = vadd.f32 %v689_v14, %v688_v12 }
 0x3d3   : > { %v649_v17 = vmul.f32 0.0625, %v647_v15  ;;  %v691_v18 = vrot.slane %v690_v16, 2 }
 0x3d5   : > { %v692_v19 = vadd.f32 %v691_v18, %v690_v16  ;;  %v650_v20 = vsub.f32 %v602_v43, %v649_v17  ;;  %v651_v21 = vsub.f32 %v604_v44, %v649_v17  ;;  %v1310_v22 = vsub.f32 %v608_v46, %v649_v17 }
 0x3d6   : > { %v1312_v23 = vsub.f32 %v610_v47, %v649_v17 }
 0x3d7   : > { %v693_v24 = vrot.slane %v692_v19, 1  ;;  %v654_v25 = vmul.f32 %v650_v20, %v650_v20  ;;  %v655_v26 = vmul.f32 %v651_v21, %v651_v21  ;;  %v656_v29 = vmul.f32 %v1310_v22, %v1310_v22 }
 0x3d8   : > { %v657_v30 = vmul.f32 %v1312_v23, %v1312_v23 }
 0x3d9   : > { %v694_v27 = vadd.f32 %v693_v24, %v692_v19  ;;  %v658_v28 = vadd.f32 %v655_v26, %v654_v25 }
 0x3da   : > { %v661_v32 = vadd.f32 %v657_v30, %v656_v29 }
 0x3db   : > { %v695_v31 = vmul.f32 0.0625, %v694_v27  ;;  %659 = vadd.xlane.f32.xlu1 %v658_v28 }
 0x3dd   : > { %v1318_v33 = vsub.f32 %v614_v49, %v695_v31  ;;  %v1320_v34 = vsub.f32 %v616_v50, %v695_v31  ;;  %v1341_v43 = vsub.f32 %v620_v52, %v695_v31  ;;  %v1343_v44 = vsub.f32 %v622_v53, %v695_v31  ;;  %v630_v49 = vld [vmem:[%s1496_s6 + $0x8] sm:$0xff]  ;;  %v631_v50 = vld [vmem:[%s1496_s6 + $0x10] sm:$0xff] }
 0x3df   : > { %662 = vadd.xlane.f32.xlu1 %v661_v32  ;;  %v700_v35 = vmul.f32 %v1318_v33, %v1318_v33  ;;  %v701_v36 = vmul.f32 %v1320_v34, %v1320_v34  ;;  %v702_v45 = vmul.f32 %v1341_v43, %v1341_v43  ;;  %v703_v46 = vmul.f32 %v1343_v44, %v1343_v44 }
 0x3e1   : > { %v704_v37 = vadd.f32 %v701_v36, %v700_v35  ;;  %v707_v47 = vadd.f32 %v703_v46, %v702_v45 }
 0x3e3   : > { %705 = vadd.xlane.f32.xlu0 %v704_v37 }
 0x3f0   : > { %733 = vperm.xlu1 %1053, %v626_v38  }
 0x3f9   : > { %728 = vperm.xlu0 %1052, %v625_v39  }
 0x3fd   : > { %756 = vperm.xlu0 %1052, %v629_v40  }
 0x401   : > { %743 = vperm.xlu0 %1052, %v628_v41  }
 0x405   : > { %771 = vperm.xlu0 %1052, %v632_v42  }
 0x414   : > { %708 = vadd.xlane.f32.xlu1 %v707_v47 }
 0x425   : > { %738 = vperm.xlu1 %1053, %v627_v48  }
 0x429   : > { %761 = vperm.xlu1 %1053, %v630_v49  }
 0x42d   : > { %766 = vperm.xlu1 %1053, %v631_v50  }
 0x468   : > { %v660_v51 = vpop.xlane.xlu1 %659 }
 0x469   : > { %v664_v53 = vmul.f32 0.00390625, %v660_v51 }
 0x46c   : > { %v663_v52 = vpop.xlane.xlu1 %662 }
 0x46d   : > { %v665_v0 = vmul.f32 0.00390625, %v663_v52 }
 0x46f   : > { %v666_v54 = vadd.f32 %v665_v0, %v664_v53 }
 0x470   : > { %v706_v63 = vpop.xlane.xlu0 %705  ;;  %v734_v19 = vpop.permute.xlu1 %733 }
 0x471   : > { %v667_v55 = vrot.slane %v666_v54, 4  ;;  %v710_v25 = vmul.f32 0.00390625, %v706_v63  ;;  %v798_v63 = vld [vmem:[%s1497_s7] sm:$0xff] }
 0x473   : > { %v668_v56 = vadd.f32 %v667_v55, %v666_v54 }
 0x475   : > { %v669_v57 = vrot.slane %v668_v56, 2 }
 0x477   : > { %v670_v58 = vadd.f32 %v669_v57, %v668_v56 }
 0x478   : > { %v729_v4 = vpop.permute.xlu0 %728 }
 0x479   : > { %v671_v59 = vrot.slane %v670_v58, 1 }
 0x47b   : > { %v672_v60 = vadd.f32 %v671_v59, %v670_v58 }
 0x47c   : > { %v757_v15 = vpop.permute.xlu0 %756 }
 0x47d   : > { %v673_v61 = vmul.f32 0.0625, %v672_v60 }
 0x47f   : > { %v674_v62 = vadd.f32 1e-05, %v673_v61  ;;  %v799_v61 = vld [vmem:[%s1497_s7 + $0x8] sm:$0xff] }
 0x480   : > { %v744_v45 = vpop.permute.xlu0 %743 }
 0x481   : > { %1058 = vrsqrt.f32 %v674_v62 }
 0x484   : > { %v772_v54 = vpop.permute.xlu0 %771 }
 0x48b   : > { %v1059_v8 = vpop.eup %1058 }
 0x48c   : > { %v676_v9 = vmul.f32 %v1059_v8, %v650_v20  ;;  %v677_v12 = vmul.f32 %v1059_v8, %v651_v21  ;;  %v678_v27 = vmul.f32 %v1059_v8, %v1310_v22  ;;  %v679_v20 = vmul.f32 %v1059_v8, %v1312_v23 }
 0x48e   : > { %v746_v13 = vmul.f32 %v729_v4, %v676_v9  ;;  %v747_v14 = vmul.f32 %v729_v4, %v677_v12  ;;  %v748_v30 = vmul.f32 %v734_v19, %v678_v27  ;;  %v749_v31 = vmul.f32 %v734_v19, %v679_v20  ;;  %v800_v9 = vld [vmem:[%s1497_s7 + $0x10] sm:$0xff] }
 0x490   : > { %v1358_v16 = vadd.f32 %v757_v15, %v746_v13  ;;  %v1360_v17 = vadd.f32 %v757_v15, %v747_v14  ;;  %v801_v13 = vld [vmem:[%s1497_s7 + $0x18] sm:$0xff] }
 0x492   : > { %v782_v18 = vadd.f32 %v1360_v17, %v1358_v16 }
 0x494   : > { %783 = vadd.xlane.f32.xlu1 %v782_v18 }
 0x4a1   : > { %v709_v24 = vpop.xlane.xlu1 %708 }
 0x4a2   : > { %v711_v26 = vmul.f32 0.00390625, %v709_v24 }
 0x4a4   : > { %v712_v21 = vadd.f32 %v711_v26, %v710_v25 }
 0x4a5   : > { %v739_v28 = vpop.permute.xlu1 %738 }
 0x4a6   : > { %v713_v29 = vrot.slane %v712_v21, 4 }
 0x4a8   : > { %v714_v32 = vadd.f32 %v713_v29, %v712_v21 }
 0x4a9   : > { %v762_v35 = vpop.permute.xlu1 %761 }
 0x4aa   : > { %v715_v36 = vrot.slane %v714_v32, 2  ;;  %v1366_v37 = vadd.f32 %v762_v35, %v748_v30  ;;  %v1368_v38 = vadd.f32 %v762_v35, %v749_v31 }
 0x4ac   : > { %v716_v39 = vadd.f32 %v715_v36, %v714_v32  ;;  %v785_v40 = vadd.f32 %v1368_v38, %v1366_v37 }
 0x4ad   : > { %v767_v55 = vpop.permute.xlu1 %766 }
 0x4ae   : > { %v717_v41 = vrot.slane %v716_v39, 1  ;;  %786 = vadd.xlane.f32.xlu0 %v785_v40  ;;  %v822_v40 = vld [vmem:[%s1498_s8 + $0x8] sm:$0xff] }
 0x4b0   : > { %v718_v22 = vadd.f32 %v717_v41, %v716_v39  ;;  %v821_v41 = vld [vmem:[%s1498_s8] sm:$0xff] }
 0x4b2   : > { %v719_v23 = vmul.f32 0.0625, %v718_v22 }
 0x4b4   : > { %v720_v42 = vadd.f32 1e-05, %v719_v23  ;;  %v824_v23 = vld [vmem:[%s1498_s8 + $0x18] sm:$0xff] }
 0x4b6   : > { %1060 = vrsqrt.f32 %v720_v42  ;;  %v823_v42 = vld [vmem:[%s1498_s8 + $0x10] sm:$0xff] }
 0x4c0   : > { %v1061_v46 = vpop.eup %1060 }
 0x4c1   : > { %v722_v47 = vmul.f32 %v1061_v46, %v1318_v33  ;;  %v723_v48 = vmul.f32 %v1061_v46, %v1320_v34  ;;  %v724_v49 = vmul.f32 %v1061_v46, %v1341_v43  ;;  %v725_v50 = vmul.f32 %v1061_v46, %v1343_v44 }
 0x4c3   : > { %v750_v51 = vmul.f32 %v739_v28, %v722_v47  ;;  %v751_v52 = vmul.f32 %v739_v28, %v723_v48  ;;  %v752_v53 = vmul.f32 %v744_v45, %v724_v49  ;;  %v753_v0 = vmul.f32 %v744_v45, %v725_v50 }
 0x4c5   : > { %v1376_v56 = vadd.f32 %v767_v55, %v750_v51  ;;  %v1378_v57 = vadd.f32 %v767_v55, %v751_v52  ;;  %v1380_v58 = vadd.f32 %v772_v54, %v752_v53  ;;  %v1382_v59 = vadd.f32 %v772_v54, %v753_v0 }
 0x4c7   : > { %v791_v33 = vadd.f32 %v1382_v59, %v1380_v58  ;;  %v788_v34 = vadd.f32 %v1378_v57, %v1376_v56 }
 0x4c9   : > { %792 = vadd.xlane.f32.xlu1 %v791_v33  ;;  %789 = vadd.xlane.f32.xlu0 %v788_v34 }
 0x521   : > { %v784_v44 = vpop.xlane.xlu1 %783 }
 0x522   : > { %v794_v62 = vmul.f32 0.00390625, %v784_v44 }
 0x524   : > { %v802_v8 = vmul.f32 %v798_v63, %v794_v62 }
 0x526   : > { %v807_v24 = vsel %vm806_vm2, %v802_v8, 0.0 }
 0x53b   : > { %v787_v43 = vpop.xlane.xlu0 %786 }
 0x53c   : > { %v795_v60 = vmul.f32 0.00390625, %v787_v43 }
 0x53e   : > { %v803_v4 = vmul.f32 %v799_v61, %v795_v60 }
 0x540   : > { %v808_v15 = vsel %vm806_vm2, %v803_v4, 0.0 }
 0x541   : > { %v809_v27 = vadd.f32 %v808_v15, %v807_v24 }
 0x556   : > { %v790_v12 = vpop.xlane.xlu0 %789  ;;  %v793_v14 = vpop.xlane.xlu1 %792 }
 0x557   : > { %v796_v18 = vmul.f32 0.00390625, %v790_v12  ;;  %v797_v19 = vmul.f32 0.00390625, %v793_v14 }
 0x559   : > { %v804_v25 = vmul.f32 %v800_v9, %v796_v18  ;;  %v805_v26 = vmul.f32 %v801_v13, %v797_v19 }
 0x55b   : > { %v810_v20 = vsel %vm806_vm2, %v804_v25, 0.0  ;;  %v812_v28 = vsel %vm806_vm2, %v805_v26, 0.0 }
 0x55c   : > { %v811_v21 = vadd.f32 %v810_v20, %v809_v27 }
 0x55e   : > { %v813_v29 = vadd.f32 %v812_v28, %v811_v21 }
 0x560   : > { %v814_v30 = vrot.slane %v813_v29, 4 }
 0x562   : > { %v815_v31 = vadd.f32 %v814_v30, %v813_v29 }
 0x564   : > { %v816_v32 = vrot.slane %v815_v31, 2 }
 0x566   : > { %v817_v35 = vadd.f32 %v816_v32, %v815_v31 }
 0x568   : > { %v818_v36 = vrot.slane %v817_v35, 1 }
 0x56a   : > { %v819_v39 = vadd.f32 %v818_v36, %v817_v35 }
 0x56c   : > { %v820_v22 = vmax.f32 %v819_v39, 0.0 }
 0x56e   : > { %v826_v45 = vmul.f32 %v822_v40, %v820_v22  ;;  %v825_v46 = vmul.f32 %v821_v41, %v820_v22  ;;  %v828_v49 = vmul.f32 %v824_v23, %v820_v22  ;;  %v827_v50 = vmul.f32 %v823_v42, %v820_v22 }
 0x570   : > { %v832_v47 = vsel %vm806_vm2, %v826_v45, 0.0  ;;  %v829_v48 = vsel %vm806_vm2, %v825_v46, 0.0  ;;  %v838_v51 = vsel %vm806_vm2, %v828_v49, 0.0  ;;  %v835_v52 = vsel %vm806_vm2, %v827_v50, 0.0 }
 0x571   : > { %833 = vadd.xlane.f32.xlu1 %v832_v47  ;;  %830 = vadd.xlane.f32.xlu0 %v829_v48 }
 0x575   : > { %839 = vadd.xlane.f32.xlu1 %v838_v51  ;;  %836 = vadd.xlane.f32.xlu0 %v835_v52 }
 0x5fe   : > { %v834_v53 = vpop.xlane.xlu1 %833  ;;  %v831_v0 = vpop.xlane.xlu0 %830 }
 0x5ff   : > { %v842_v54 = vsub.f32 0.0, %v834_v53  ;;  %v841_v55 = vsub.f32 0.0, %v831_v0 }
 0x601   : > { %v847_v33 = vmul.f32 1.442695, %v842_v54  ;;  %v845_v34 = vmul.f32 1.442695, %v841_v55 }
 0x602   : > { %v840_v43 = vpop.xlane.xlu1 %839  ;;  %v837_v44 = vpop.xlane.xlu0 %836 }
 0x603   : > { %1062 = vpow2.f32 %v847_v33  ;;  %v844_v60 = vsub.f32 0.0, %v840_v43  ;;  %v843_v61 = vsub.f32 0.0, %v837_v44 }
 0x604   : > { %1064 = vpow2.f32 %v845_v34 }
 0x605   : > { %v851_v62 = vmul.f32 1.442695, %v844_v60  ;;  %v849_v63 = vmul.f32 1.442695, %v843_v61 }
 0x607   : > { %1066 = vpow2.f32 %v851_v62 }
 0x608   : > { %1068 = vpow2.f32 %v849_v63 }
 0x60d   : > { %v1063_v4 = vpop.eup %1062 }
 0x60e   : > { %v1065_v8 = vpop.eup %1064  ;;  %v854_v9 = vadd.f32 1.0, %v1063_v4 }
 0x60f   : > { %v853_v12 = vadd.f32 1.0, %v1065_v8 }
 0x610   : > { %1070 = vrcp.f32 %v854_v9 }
 0x611   : > { %v1067_v13 = vpop.eup %1066  ;;  %1072 = vrcp.f32 %v853_v12 }
 0x612   : > { %v1069_v14 = vpop.eup %1068  ;;  %v856_v15 = vadd.f32 1.0, %v1067_v13 }
 0x613   : > { %v855_v18 = vadd.f32 1.0, %v1069_v14 }
 0x614   : > { %1074 = vrcp.f32 %v856_v15 }
 0x615   : > { %1076 = vrcp.f32 %v855_v18 }
 0x61a   : > { %v1071_v19 = vpop.eup %1070 }
 0x61b   : > { %v1073_v24 = vpop.eup %1072  ;;  %v866_v25 = vadd.f32 1.0, %v1071_v19 }
 0x61c   : > { %v865_v26 = vadd.f32 1.0, %v1073_v24 }
 0x61d   : > { %v871_v27 = vmul.f32 %v866_v25, %v1366_v37  ;;  %v872_v20 = vmul.f32 %v866_v25, %v1368_v38 }
 0x61e   : > { %v1075_v21 = vpop.eup %1074  ;;  %v869_v28 = vmul.f32 %v865_v26, %v1358_v16  ;;  %v870_v29 = vmul.f32 %v865_v26, %v1360_v17 }
 0x61f   : > { %v1077_v30 = vpop.eup %1076  ;;  %v879_v31 = vadd.f32 %v871_v27, %v1260_v5  ;;  %v880_v32 = vadd.f32 %v872_v20, %v1254_v2  ;;  %v868_v35 = vadd.f32 1.0, %v1075_v21 }
 0x620   : > { %v877_v36 = vadd.f32 %v869_v28, %v1256_v3  ;;  %v878_v39 = vadd.f32 %v870_v29, %v1252_v1  ;;  %v867_v40 = vadd.f32 1.0, %v1077_v30 }
 0x621   : > { %v887_v37 = vmax.f32 %v879_v31, 0.0  ;;  %v888_v41 = vmax.f32 %v880_v32, 0.0  ;;  %v875_v38 = vmul.f32 %v868_v35, %v1380_v58  ;;  %v876_v16 = vmul.f32 %v868_v35, %v1382_v59 }
 0x622   : > { %v885_v22 = vmax.f32 %v877_v36, 0.0  ;;  %v886_v17 = vmax.f32 %v878_v39, 0.0  ;;  %v873_v23 = vmul.f32 %v867_v40, %v1376_v56  ;;  %v874_v5 = vmul.f32 %v867_v40, %v1378_v57 }
 0x623   : > { %895 = vst [vmem:[%s325_s21 + $0x10] sm:$0xff] %v887_v37  ;;  %896 = vst [vmem:[%s325_s21 + $0x18] sm:$0xff] %v888_v41  ;;  %v883_v1 = vadd.f32 %v875_v38, %v1272_v11  ;;  %v884_v2 = vadd.f32 %v876_v16, %v1264_v7 }
 0x624   : > { %893 = vst [vmem:[%s325_s21] sm:$0xff] %v885_v22  ;;  %894 = vst [vmem:[%s325_s21 + $0x8] sm:$0xff] %v886_v17  ;;  %v881_v3 = vadd.f32 %v873_v23, %v1270_v10  ;;  %v882_v58 = vadd.f32 %v874_v5, %v1262_v6 }
 0x625   : > { %v891_v56 = vmax.f32 %v883_v1, 0.0  ;;  %v892_v59 = vmax.f32 %v884_v2, 0.0 }
 0x626   : > { %v889_v7 = vmax.f32 %v881_v3, 0.0  ;;  %v890_v11 = vmax.f32 %v882_v58, 0.0 }
 0x627   : > { %899 = vst [vmem:[%s325_s21 + $0x30] sm:$0xff] %v891_v56  ;;  %900 = vst [vmem:[%s325_s21 + $0x38] sm:$0xff] %v892_v59 }
 0x628   : > { %897 = vst [vmem:[%s325_s21 + $0x20] sm:$0xff] %v889_v7  ;;  %898 = vst [vmem:[%s325_s21 + $0x28] sm:$0xff] %v890_v11 }
 0x629   : > { %1091 = shalt.err (!%p1088_p3)
}
 0x62a   : > { %s1092_s14 = scalar_lea.hbm %s1443_s24, 1024  ;;  %s1096_s21 = scalar_lea.hbm %s1499_s9, 2048 }
 0x62b   : > { %p1093_p4 = scmp.ne.s32.totalorder %s1443_s24, %s1092_s14  ;;  %p1097_p9 = scmp.lt.u32.totalorder %s1443_s24, %s1499_s9 }
 0x62c   : > { %p1098_p10 = scmp.lt.u32.totalorder %s1096_s21, %s1092_s14  ;;  %p1100_p12 = scmp.lt.u32.totalorder %s1092_s14, %s1443_s24 }
 0x62d   : > { %p1094_p7 = pnand %p1093_p4, %p1235_p5 }
 0x62e   : > { %p1099_p11 = por %p1098_p10, %p1097_p9 }
 0x62f   : > { %p1095_p8 = pneg %p1094_p7 }
 0x630   : > { %p1101_p13 = por %p1100_p12, %p1099_p11 }
 0x632   : > { %p1102_p0 = pnand %p1101_p13, %p1095_p8 }
 0x634   : > { %1105 = shalt.err (!%p1102_p0)
}
 0x635   : > { %s1145_s26 = smov 256   ;;  %s1146_s27 = smov 16  }
 0x636   : > { %1009 = dma.vmem_to_hbm [thread:$0]  (%p1235_p5), %s1445_s22, 1024, %s1443_s24, %s1449_s25, %s1145_s26, %s1145_s26, %s1146_s27  }
 0x637 PF: > { %p1015_p1 = scmp.ge.s32.totalorder %s1140_s12, 2  ;;  %s930_s28 = sand.u32 1, %s1128_s30  }
 0x638   : > { %s931_s29 = scalar_lea.sflag [#allocation3], %s930_s28 }
 0x639   : > { %p1012_p2 = pnand %p1015_p1, %p1239_p6 }
 0x63b   : > { %1123 = dma.done.wait (!%p1012_p2), %s931_s29, 1024  }
 0x63c   : > { %1125 = vsyncadd (!%p1012_p2), %s931_s29, 4294966272  ;;  %p19_p3 = scmp.ge.s32.totalorder %s1222_s15, 4   ;;  %s1502_s30 = smov %s1132_s10 }
 0x63d   : > { %s1503_s10 = smov %s1136_s11  ;;  %s1504_s11 = smov %s1233_s18 }
 0x63e   : > { %s1505_s12 = smov %s1222_s15  ;;  %21 = sbr.rel (!%p19_p3) target bundleno = 3 (0x3), region = 91 }
 0x645   :  { %936 = vsyncpa [#allocation3], 1 }
 0x646   :  { %938 = vsyncpa [#allocation3 + $0x1], 1 }

</bundles_post_ra>
